<compile_context>
chip_gen: v7x
topology: tpu7x:2x2x1
jax: 0.10.0
libtpu: 0.0.40
codegen_flags: <defaults>
</compile_context>

<pallas_src>
import functools

import jax
import jax.numpy as jnp
from jax.experimental import pallas as pl
from jax.experimental.pallas import tpu as pltpu

_LANE = 128
_NEG_BIG = -1e30  # softmax-padding bias value; exp(-1e30 - m) underflows to exactly 0.


def _round_up(x, m):
    return ((x + m - 1) // m) * m


# ----------------------------- kernel body ---------------------------------


def actor_kernel(x_ref, w1_ref, b1_ref, w2_ref, b2_ref, w3_ref, b3_ref, o_ref,
                 *, approx_recip):
    x = x_ref[...]                                                    # (bm, D_in) f32

    # Linear(input_dim, 128) + ReLU  (MXU in weight dtype, f32 accumulation)
    h1 = jnp.dot(x.astype(w1_ref.dtype), w1_ref[...],
                 preferred_element_type=jnp.float32) + b1_ref[...]
    h1 = jnp.maximum(h1, 0.0)

    # Linear(128, 256) + ReLU
    h2 = jnp.dot(h1.astype(w2_ref.dtype), w2_ref[...],
                 preferred_element_type=jnp.float32) + b2_ref[...]
    h2 = jnp.maximum(h2, 0.0)

    # Linear(256, out_dim padded to 128 lanes). Padded lanes carry a -1e30 f32 bias
    # (added post-accumulation) so their exp() is exactly 0 and the softmax over all
    # 128 lanes equals the softmax over the real out_dim lanes.
    logits = jnp.dot(h2.astype(w3_ref.dtype), w3_ref[...],
                     preferred_element_type=jnp.float32) + b3_ref[...]

    # Numerically stable softmax(dim=-1)
    m = jnp.max(logits, axis=-1, keepdims=True)
    e = jnp.exp(logits - m)
    denom = jnp.sum(e, axis=-1, keepdims=True)
    if approx_recip:
        probs = e * pl.reciprocal(denom, approx=True)   # EUP vrcp slot, VALU-free
    else:
        probs = e / denom                               # exact normalization
    o_ref[...] = probs.astype(o_ref.dtype)


# --------------------------- one-time param prep ----------------------------


def prepare_params(params, *, matmul_dtype=jnp.float32):
    """One-time parameter prep — call OUTSIDE the per-step path.

    * Pads the last Linear to 128 output lanes (zero weights + -1e30 bias) so the
      kernel's output store is lane-dense and the softmax math stays exact.
    * Casts weight matrices to the MXU operand dtype. bf16 is recommended on ALL
      generations (v5e/v6e/v7x MXUs are natively bf16); biases stay f32 because they
      are added after f32 accumulation (keeps the -1e30 padding trick exact).

    Returns (prepped_params_dict, out_dim).
    """
    w1, b1, w2, b2, w3, b3 = (params[k] for k in ("w1", "b1", "w2", "b2", "w3", "b3"))
    out_dim = w3.shape[1]
    out_pad = _round_up(out_dim, _LANE)
    if out_pad != out_dim:
        w3 = jnp.pad(w3, ((0, 0), (0, out_pad - out_dim)))
        b3 = jnp.pad(b3, ((0, 0), (0, out_pad - out_dim)), constant_values=_NEG_BIG)
    prepped = {
        "w1": w1.astype(matmul_dtype), "b1": b1.astype(jnp.float32),
        "w2": w2.astype(matmul_dtype), "b2": b2.astype(jnp.float32),
        "w3": w3.astype(matmul_dtype), "b3": b3.astype(jnp.float32),
    }
    return prepped, out_dim


# ------------------------------ tiling choice --------------------------------


def _choose_batch_tile(B, block_batch):
    """Pick (bm, b_pad): batch tile (multiple of 8) and padded batch size.

    * Large tiles (default 512) amortize the ~0.35 us/step grid overhead.
    * >=2 grid steps whenever B >= 16 so v7x's two TensorCores both get work under
      dimension_semantics=("parallel",).
    * bm divides B exactly in the common case, so no wrapper-side jnp.pad of x;
      only a ragged tail (< bm rows) is ever padded.
    """
    if B < 16:
        bm = _round_up(max(B, 1), 8)
        return bm, bm
    n_steps = max(2, pl.cdiv(B, block_batch))
    bm = _round_up(pl.cdiv(B, n_steps), 8)
    return bm, _round_up(B, bm)


# ------------------------------ forward wrapper -------------------------------


def actor_forward(x, prepped, out_dim, *, block_batch=512, approx_recip=False,
                  out_dtype=jnp.float32):
    """x: (B, input_dim) f32; prepped/out_dim from prepare_params().

    approx_recip=True puts the softmax denominator on the EUP (rows then sum to 1
    only within ~1e-3). out_dtype=jnp.bfloat16 halves the dominant output HBM stream
    (useful on v5e/v6e if downstream sampling tolerates bf16 probabilities).
    """
    w1, b1, w2, b2, w3, b3 = (prepped[k] for k in ("w1", "b1", "w2", "b2", "w3", "b3"))
    B, d_in = x.shape
    out_pad = w3.shape[1]

    bm, b_pad = _choose_batch_tile(B, block_batch)
    if b_pad != B:  # only the ragged tail rows of the last tile are padded
        x = jnp.pad(x, ((0, b_pad - B), (0, 0)))
    grid = (b_pad // bm,)

    x_spec = pl.BlockSpec((bm, d_in), lambda i: (i, 0))
    out_spec = pl.BlockSpec((bm, out_pad), lambda i: (i, 0))

    def resident(arr):
        # Same block every grid step -> loaded once, stays VMEM-resident.
        # (~0.6 MiB total today; if hidden dims ever grow, drop these to
        #  pipeline_mode=pl.Buffered(1) to halve their VMEM footprint on v7x.)
        return pl.BlockSpec(arr.shape, lambda i: (0, 0))

    kernel = functools.partial(actor_kernel, approx_recip=approx_recip)

    out = pl.pallas_call(
        kernel,
        out_shape=jax.ShapeDtypeStruct((b_pad, out_pad), out_dtype),
        grid_spec=pltpu.PrefetchScalarGridSpec(
            num_scalar_prefetch=0,
            grid=grid,
            in_specs=[x_spec,
                      resident(w1), resident(b1),
                      resident(w2), resident(b2),
                      resident(w3), resident(b3)],
            out_specs=out_spec,
        ),
        compiler_params=pltpu.CompilerParams(
            dimension_semantics=("parallel",),  # v7x: shard batch tiles over 2 TCs
        ),
    )(x, w1, b1, w2, b2, w3, b3)

    out = out[:, :out_dim]
    if b_pad != B:
        out = out[:B]
    return out


# ------------------------------ param init ------------------------------------


def init_params(key, input_dim, output_dim):
    """Deterministic init mimicking nn.Linear's U(-1/sqrt(fan_in), 1/sqrt(fan_in))."""
    dims = [(input_dim, 128), (128, 256), (256, output_dim)]
    params = {}
    for i, (fan_in, fan_out) in enumerate(dims, start=1):
        key, kw, kb = jax.random.split(key, 3)
        bound = 1.0 / jnp.sqrt(fan_in)
        params[f"w{i}"] = jax.random.uniform(
            kw, (fan_in, fan_out), jnp.float32, minval=-bound, maxval=bound
        )
        params[f"b{i}"] = jax.random.uniform(
            kb, (1, fan_out), jnp.float32, minval=-bound, maxval=bound
        )
    return params


if __name__ == "__main__":
    key = jax.random.PRNGKey(0)
    k_x, k_p = jax.random.split(key)

    batch, input_dim, output_dim = 64, 32, 16
    x = jax.random.normal(k_x, (batch, input_dim), jnp.float32)
    params = init_params(k_p, input_dim, output_dim)

    # reference in plain JAX (exact semantics of the PyTorch module)
    def ref(x, p):
        h1 = jax.nn.relu(x @ p["w1"] + p["b1"])
        h2 = jax.nn.relu(h1 @ p["w2"] + p["b2"])
        return jax.nn.softmax(h2 @ p["w3"] + p["b3"], axis=-1)

    expected = ref(x, params)

    # exact path: f32 MXU operands, exact softmax normalization
    prepped_f32, out_dim = prepare_params(params, matmul_dtype=jnp.float32)
    probs = actor_forward(x, prepped_f32, out_dim)
    jax.block_until_ready(probs)
    assert probs.shape == (batch, output_dim)
    assert jnp.allclose(jnp.sum(probs, axis=-1), 1.0, atol=1e-5)
    assert jnp.allclose(probs, expected, atol=1e-5), "mismatch vs JAX reference (f32)"

    # fast path: bf16 MXU operands / f32 accumulation + EUP approx reciprocal
    # (recommended on v5e, v6e and v7x; elementwise work stays f32)
    prepped_bf16, _ = prepare_params(params, matmul_dtype=jnp.bfloat16)
    probs_bf16 = actor_forward(x, prepped_bf16, out_dim, approx_recip=True)
    jax.block_until_ready(probs_bf16)
    assert probs_bf16.shape == (batch, output_dim)
    assert jnp.allclose(probs_bf16, expected, atol=3e-2), "mismatch vs JAX reference (bf16)"

    print("KERNEL_OK")
</pallas_src>

<mosaic_0001>
module attributes {stable_mosaic.version = 11 : i64} {
  func.func @actor_kernel(%arg0: i32, %arg1: memref<32x32xf32, #tpu.memory_space<vmem>>, %arg2: memref<32x128xf32, #tpu.memory_space<vmem>>, %arg3: memref<1x128xf32, #tpu.memory_space<vmem>>, %arg4: memref<128x256xf32, #tpu.memory_space<vmem>>, %arg5: memref<1x256xf32, #tpu.memory_space<vmem>>, %arg6: memref<256x128xf32, #tpu.memory_space<vmem>>, %arg7: memref<1x128xf32, #tpu.memory_space<vmem>>, %arg8: memref<32x128xf32, #tpu.memory_space<vmem>>) attributes {dimension_semantics = [#tpu.dimension_semantics<parallel>], iteration_bounds = array<i64: 2>, scalar_prefetch = 0 : i64, scratch_operands = 0 : i64, tpu.core_type = #tpu.core_type<tc>, window_params = [{transform_indices = @transform_0, window_bounds = array<i64: 32, 32>}, {pipeline_mode = #tpu.pipeline_mode<synchronous>, transform_indices = @transform_1, window_bounds = array<i64: 32, 128>}, {pipeline_mode = #tpu.pipeline_mode<synchronous>, transform_indices = @transform_2, window_bounds = array<i64: 1, 128>}, {pipeline_mode = #tpu.pipeline_mode<synchronous>, transform_indices = @transform_3, window_bounds = array<i64: 128, 256>}, {pipeline_mode = #tpu.pipeline_mode<synchronous>, transform_indices = @transform_4, window_bounds = array<i64: 1, 256>}, {pipeline_mode = #tpu.pipeline_mode<synchronous>, transform_indices = @transform_5, window_bounds = array<i64: 256, 128>}, {pipeline_mode = #tpu.pipeline_mode<synchronous>, transform_indices = @transform_6, window_bounds = array<i64: 1, 128>}, {transform_indices = @transform_7, window_bounds = array<i64: 32, 128>}]} {
    %c0 = arith.constant 0 : index
    %c0_0 = arith.constant 0 : index
    %0 = vector.load %arg1[%c0, %c0_0] : memref<32x32xf32, #tpu.memory_space<vmem>>, vector<32x32xf32>
    %c0_1 = arith.constant 0 : index
    %c0_2 = arith.constant 0 : index
    %1 = vector.load %arg2[%c0_1, %c0_2] : memref<32x128xf32, #tpu.memory_space<vmem>>, vector<32x128xf32>
    %cst = arith.constant dense<0.000000e+00> : vector<32x128xf32>
    %2 = tpu.matmul %0, %1, %cst {dimension_numbers = #tpu.dot_dimension_numbers<[1], [0], [0], [1], [0, 0, 1, 1], [], []>} : vector<32x32xf32>, vector<32x128xf32>, vector<32x128xf32> -> vector<32x128xf32>
    %c0_3 = arith.constant 0 : index
    %c0_4 = arith.constant 0 : index
    %3 = vector.load %arg3[%c0_3, %c0_4] : memref<1x128xf32, #tpu.memory_space<vmem>>, vector<1x128xf32>
    %4 = vector.broadcast %3 : vector<1x128xf32> to vector<32x128xf32>
    %5 = arith.addf %2, %4 : vector<32x128xf32>
    %cst_5 = arith.constant 0.000000e+00 : f32
    %6 = vector.broadcast %cst_5 : f32 to vector<32x128xf32>
    %7 = arith.maximumf %5, %6 : vector<32x128xf32>
    %c0_6 = arith.constant 0 : index
    %c0_7 = arith.constant 0 : index
    %8 = vector.load %arg4[%c0_6, %c0_7] : memref<128x256xf32, #tpu.memory_space<vmem>>, vector<128x256xf32>
    %cst_8 = arith.constant dense<0.000000e+00> : vector<32x256xf32>
    %9 = tpu.matmul %7, %8, %cst_8 {dimension_numbers = #tpu.dot_dimension_numbers<[1], [0], [0], [1], [0, 0, 1, 1], [], []>} : vector<32x128xf32>, vector<128x256xf32>, vector<32x256xf32> -> vector<32x256xf32>
    %c0_9 = arith.constant 0 : index
    %c0_10 = arith.constant 0 : index
    %10 = vector.load %arg5[%c0_9, %c0_10] : memref<1x256xf32, #tpu.memory_space<vmem>>, vector<1x256xf32>
    %11 = vector.broadcast %10 : vector<1x256xf32> to vector<32x256xf32>
    %12 = arith.addf %9, %11 : vector<32x256xf32>
    %cst_11 = arith.constant 0.000000e+00 : f32
    %13 = vector.broadcast %cst_11 : f32 to vector<32x256xf32>
    %14 = arith.maximumf %12, %13 : vector<32x256xf32>
    %c0_12 = arith.constant 0 : index
    %c0_13 = arith.constant 0 : index
    %15 = vector.load %arg6[%c0_12, %c0_13] : memref<256x128xf32, #tpu.memory_space<vmem>>, vector<256x128xf32>
    %cst_14 = arith.constant dense<0.000000e+00> : vector<32x128xf32>
    %16 = tpu.matmul %14, %15, %cst_14 {dimension_numbers = #tpu.dot_dimension_numbers<[1], [0], [0], [1], [0, 0, 1, 1], [], []>} : vector<32x256xf32>, vector<256x128xf32>, vector<32x128xf32> -> vector<32x128xf32>
    %c0_15 = arith.constant 0 : index
    %c0_16 = arith.constant 0 : index
    %17 = vector.load %arg7[%c0_15, %c0_16] : memref<1x128xf32, #tpu.memory_space<vmem>>, vector<1x128xf32>
    %18 = vector.broadcast %17 : vector<1x128xf32> to vector<32x128xf32>
    %19 = arith.addf %16, %18 : vector<32x128xf32>
    %cst_17 = arith.constant dense<0xFF800000> : vector<32xf32>
    %20 = vector.multi_reduction <maximumf>, %19, %cst_17 [1] : vector<32x128xf32> to vector<32xf32>
    %21 = vector.shape_cast %20 : vector<32xf32> to vector<32x1xf32>
    %22 = vector.broadcast %21 : vector<32x1xf32> to vector<32x128xf32>
    %23 = arith.subf %19, %22 : vector<32x128xf32>
    %24 = math.exp %23 : vector<32x128xf32>
    %cst_18 = arith.constant dense<0.000000e+00> : vector<32xf32>
    %25 = vector.multi_reduction <add>, %24, %cst_18 [1] : vector<32x128xf32> to vector<32xf32>
    %26 = vector.shape_cast %25 : vector<32xf32> to vector<32x1xf32>
    %27 = vector.broadcast %26 : vector<32x1xf32> to vector<32x128xf32>
    %28 = arith.divf %24, %27 : vector<32x128xf32>
    %c0_19 = arith.constant 0 : index
    %c0_20 = arith.constant 0 : index
    %29 = vector.load %arg8[%c0_19, %c0_20] : memref<32x128xf32, #tpu.memory_space<vmem>>, vector<32x128xf32>
    tpu.vector_store %arg8[%c0_19, %c0_20], %28 {strides = array<i32>} : memref<32x128xf32, #tpu.memory_space<vmem>>, vector<32x128xf32>,
    return
  }
  func.func @transform_0(%arg0: i32) -> (i32, i32) {
    %c0_i32 = arith.constant 0 : i32
    %c0_i32_0 = arith.constant 0 : i32
    return %arg0, %c0_i32 : i32, i32
  }
  func.func @transform_1(%arg0: i32) -> (i32, i32) {
    %c0_i32 = arith.constant 0 : i32
    %c0_i32_0 = arith.constant 0 : i32
    %c0_i32_1 = arith.constant 0 : i32
    return %c0_i32, %c0_i32_0 : i32, i32
  }
  func.func @transform_2(%arg0: i32) -> (i32, i32) {
    %c0_i32 = arith.constant 0 : i32
    %c0_i32_0 = arith.constant 0 : i32
    %c0_i32_1 = arith.constant 0 : i32
    return %c0_i32, %c0_i32_0 : i32, i32
  }
  func.func @transform_3(%arg0: i32) -> (i32, i32) {
    %c0_i32 = arith.constant 0 : i32
    %c0_i32_0 = arith.constant 0 : i32
    %c0_i32_1 = arith.constant 0 : i32
    return %c0_i32, %c0_i32_0 : i32, i32
  }
  func.func @transform_4(%arg0: i32) -> (i32, i32) {
    %c0_i32 = arith.constant 0 : i32
    %c0_i32_0 = arith.constant 0 : i32
    %c0_i32_1 = arith.constant 0 : i32
    return %c0_i32, %c0_i32_0 : i32, i32
  }
  func.func @transform_5(%arg0: i32) -> (i32, i32) {
    %c0_i32 = arith.constant 0 : i32
    %c0_i32_0 = arith.constant 0 : i32
    %c0_i32_1 = arith.constant 0 : i32
    return %c0_i32, %c0_i32_0 : i32, i32
  }
  func.func @transform_6(%arg0: i32) -> (i32, i32) {
    %c0_i32 = arith.constant 0 : i32
    %c0_i32_0 = arith.constant 0 : i32
    %c0_i32_1 = arith.constant 0 : i32
    return %c0_i32, %c0_i32_0 : i32, i32
  }
  func.func @transform_7(%arg0: i32) -> (i32, i32) {
    %c0_i32 = arith.constant 0 : i32
    %c0_i32_0 = arith.constant 0 : i32
    return %arg0, %c0_i32 : i32, i32
  }
}

</mosaic_0001>

<bundles_post_ra>
// kernel: tpu_custom_call.1
= control target key start
LH: loop header
LB: loop body
LE: loop exit
PB: predicated region body
PF: predicated region fallthrough
CT: control target
= control target key end

     0   :  { %12 = vsyncpa [#allocation3], 0  ;;  %s1461_s0 = inlined_call_operand.vmem [shape: f32[64,32], index: 0, kind: input, shape index: {}]   ;;  %s1462_s1 = inlined_call_operand.vmem [shape: f32[32,128], index: 1, kind: input, shape index: {}]   ;;  %s1463_s2 = inlined_call_operand.vmem [shape: f32[1,128], index: 2, kind: input, shape index: {}]   ;;  %s1464_s3 = inlined_call_operand.hbm [shape: f32[128,256], index: 3, kind: input, shape index: {}]   ;;  %s1465_s4 = inlined_call_operand.vmem [shape: f32[1,256], index: 4, kind: input, shape index: {}]   ;;  %s1466_s5 = inlined_call_operand.hbm [shape: f32[256,128], index: 5, kind: input, shape index: {}]   ;;  %s1467_s6 = inlined_call_operand.vmem [shape: f32[1,128], index: 6, kind: input, shape index: {}]   ;;  %s1468_s7 = inlined_call_operand.hbm [shape: f32[64,128], index: 7, kind: output, shape index: {}]  }
   0x1   :  { %13 = vsyncpa [#allocation6], 0 }
   0x2   :  { %14 = vsyncpa [#allocation4], 0 }
   0x3   :  { %16 = vsyncpa [#allocation4 + $0x1], 0  ;;  %s1252_s24 = smov 0   ;;  %s1254_s25 = smov 0  }
   0x4   :  { %s1256_s26 = smov 0   ;;  %s1258_s27 = smov 0  }
   0x5 LB: > { %s1273_s28 = sadd.s32 4294967295, %s1200_s27   ;;  %s830_s29 = sadd.s32 4294967294, %s1200_s27   ;;  %s1200_s27 = sphi %s1258_s27, %s1488_s27   ;;  %s1196_s26 = sphi %s1256_s26, %s1487_s26   ;;  %s1192_s25 = sphi %s1254_s25, %s1486_s25   ;;  %s1188_s24 = sphi %s1252_s24, %s1485_s24  }
   0x6   : > { %s1277_s30 = sadd.s32 1, %s1200_s27   ;;  %s181_s8 = sadd.s32 1, %s1196_s26 }
   0x7   : > { %s178_s9 = ssub.s32 %s1200_s27, %s1277_s30  ;;  %p191_p0 = scmp.ne.s32.totalorder %s1196_s26, %s1192_s25 }
   0x8   : > { %p179_p1 = scmp.eq.s32.totalorder %s178_s9, 0  ;;  %p192_p2 = scmp.eq.s32.totalorder %s1273_s28, 1 }
   0x9   : > { %p197_p3 = scmp.ne.s32.totalorder %s1192_s25, %s1188_s24  ;;  %p198_p4 = scmp.eq.s32.totalorder %s830_s29, 1 }
   0xa   : > { %s1288_s10 = scalar_select %p179_p1, %s1196_s26, %s181_s8  }
   0xb   : > { %p1290_p5 = por %p192_p2, %p191_p0  ;;  %p1294_p6 = por %p198_p4, %p197_p3 }
   0xc   : > { %1472 = sst [smem:[#allocation11_spill]] %s1288_s10  ;;  %p831_p7 = scmp.ge.s32.totalorder %s1200_s27, 1 }
   0xd   : > { %s1473_s11 = scalar_select %p1290_p5, 1, 0 }
   0xe   : > { %s1474_s12 = scalar_select %p1294_p6, 1, 0 }
   0xf   : > { %p205_p8 = scmp.lt.s32.totalorder %s1200_s27, 3  ;;  %p1469_p9 = scmp.eq.s32.totalorder %s1273_s28, 0 }
  0x10   : > { %s1202_s14 = smov [#allocation2]   ;;  %s1203_s17 = smov [#allocation5]  }
  0x11   : > { %p1301_p10 = pnand %p831_p7, %p205_p8  ;;  %s223_s15 = sshll.u32 %s1202_s14, 4  ;;  %s224_s15 = int_to_ptr.vmem [resolvable:$true] %s223_s15 }
  0x12   : > { %s239_s18 = sshll.u32 %s1203_s17, 4  ;;  %s1074_s21 = scalar_lea.hbm %s1464_s3, 4096  ;;  %s1313_s18 = int_to_ptr.vmem [resolvable:$true] %s239_s18 }
  0x13   : > { %s1475_s13 = scalar_select %p1301_p10, 1, 0 }
  0x14   : > { %p1001_p11 = pneg %p1301_p10  ;;  %p1075_p13 = scmp.ne.s32.totalorder %s1464_s3, %s1074_s21 }
  0x15   : > { %p1081_p3 = scmp.lt.u32.totalorder %s1074_s21, %s1464_s3 }
  0x16   : > { %p1309_p12 = pnand %p1469_p9, %p1001_p11 }
  0x18   : > { %p1076_p0 = pneg %p1309_p12 }
  0x1a   : > { %p1077_p1 = pnand %p1076_p0, %p1075_p13 }
  0x1c   : > { %p1078_p2 = pneg %p1077_p1 }
  0x1e   : > { %p1083_p4 = pnand %p1081_p3, %p1078_p2 }
  0x20   : > { %1086 = shalt.err (!%p1083_p4)
}
  0x21   : > { %s1087_s9 = scalar_lea.vmem %s224_s15, 4096  ;;  %p1095_p9 = scmp.lt.s32.totalorder %s224_s15, %s224_s15 }
  0x22   : > { %p1088_p7 = scmp.ne.s32.totalorder %s224_s15, %s1087_s9  ;;  %p1096_p6 = scmp.lt.s32.totalorder %s1087_s9, %s1087_s9 }
  0x24   : > { %p1090_p8 = pnand %p1088_p7, %p1076_p0  ;;  %p1097_p5 = por %p1096_p6, %p1095_p9 }
  0x26   : > { %p1091_p11 = pneg %p1090_p8 }
  0x28   : > { %p1098_p10 = pnand %p1097_p5, %p1091_p11 }
  0x2a   : > { %1101 = shalt.err (!%p1098_p10)
}
  0x2b   : > { %s1204_s14 = smov 256   ;;  %s1205_s17 = smov 16  }
  0x2c   : > { %1004 = dma.hbm_to_vmem [thread:$0]  (!%p1309_p12), %s1464_s3, 4096, %s224_s15, [#allocation3], %s1204_s14, %s1204_s14, %s1205_s17  }
  0x2d   : > { %s1102_s23 = scalar_lea.hbm %s1466_s5, 4096 }
  0x2e   : > { %p1103_p13 = scmp.ne.s32.totalorder %s1466_s5, %s1102_s23  ;;  %p1109_p9 = scmp.lt.u32.totalorder %s1102_s23, %s1466_s5 }
  0x30   : > { %p1105_p5 = pnand %p1103_p13, %p1076_p0 }
  0x32   : > { %p1106_p6 = pneg %p1105_p5 }
  0x34   : > { %p1111_p10 = pnand %p1109_p9, %p1106_p6 }
  0x36   : > { %1114 = shalt.err (!%p1111_p10)
}
  0x37   : > { %s1115_s15 = scalar_lea.vmem %s1313_s18, 4096  ;;  %p1123_p4 = scmp.lt.s32.totalorder %s1313_s18, %s1313_s18 }
  0x38   : > { %p1116_p1 = scmp.ne.s32.totalorder %s1313_s18, %s1115_s15  ;;  %p1124_p7 = scmp.lt.s32.totalorder %s1115_s15, %s1115_s15 }
  0x3a   : > { %p1118_p2 = pnand %p1116_p1, %p1076_p0  ;;  %p1125_p8 = por %p1124_p7, %p1123_p4 }
  0x3c   : > { %p1119_p3 = pneg %p1118_p2 }
  0x3e   : > { %p1126_p11 = pnand %p1125_p8, %p1119_p3 }
  0x40   : > { %1129 = shalt.err (!%p1126_p11)
}
  0x41   : > { %s1206_s10 = smov 128   ;;  %s1207_s14 = smov 8  }
  0x42   : > { %1007 = dma.hbm_to_vmem [thread:$0]  (!%p1309_p12), %s1466_s5, 4096, %s1313_s18, [#allocation6], %s1206_s10, %s1206_s10, %s1207_s14  }
  0x43   : > { %p1477_p13 = scmp.ne.s32.totalorder %s1475_s13, 0 }
  0x44   : > { %p1478_p0 = scmp.eq.s32.totalorder (!%p1477_p13), %s1273_s28, 0 }
  0x45   : > { %267 = sbr.rel (%p1477_p13) target bundleno = 1082 (0x43a), region = 48 }
  0x4c   : > { %1175 = dma.done.wait (%p1478_p0), [#allocation3], 4096   ;;  %p1479_p5 = pmov %p1478_p0 }
  0x4d   : > { %p1480_p6 = pmov %p1478_p0 }
  0x4e   : > { %1177 = vsyncadd (%p1479_p5), [#allocation3], 4294963200 }
  0x4f   : > { %1179 = dma.done.wait (%p1480_p6), [#allocation6], 4096   ;;  %p1481_p9 = pmov %p1478_p0 }
  0x50   : > { %s839_s16 = sshll.u32 %s1273_s28, 2  ;;  %vm325_vm0 = vcmask 261120   ;;  %v314_v0 = vld [vmem:[%s1462_s1] sm:$0xff]  ;;  %v315_v1 = vld [vmem:[%s1462_s1 + $0x8] sm:$0xff]  ;;  %v316_v2 = vld [vmem:[%s1462_s1 + $0x10] sm:$0xff]  ;;  %v1208_v58 = vmov 0.0  }
  0x51   : > { %1181 = vsyncadd (%p1481_p9), [#allocation6], 4294963200  ;;  %p304_p10 = scmp.lt.s32.totalorder %s839_s16, 7  ;;  %v919_v3 = vpack.c.bf16 %v315_v1, %v314_v0  ;;  %v317_v4 = vld [vmem:[%s1462_s1 + $0x18] sm:$0xff]  ;;  %v428_v7 = vld [vmem:[#allocation2 + $0x8] sm:$0xff]  ;;  %535 = vmatprep.mubr.f32.mxu1 %v1208_v58  ;;  %s852_s29 = sshll.u32 %s1273_s28, 9 }
  0x52   : > { %v923_v6 = vpack.c.bf16 %v317_v4, %v316_v2  ;;  %v430_v8 = vld [vmem:[#allocation2 + $0x18] sm:$0xff]  ;;  %v427_v9 = vld [vmem:[#allocation2] sm:$0xff]  ;;  %v429_v10 = vld [vmem:[#allocation2 + $0x10] sm:$0xff]  ;;  %s1416_s10 = scalar_lea.hbm %s1468_s7, %s852_s29  ;;  %p1482_p1 = scmp.ne.s32.totalorder %s1473_s11, 0 }
  0x53   : > { %s1490_s16 = smov (!%p304_p10, %s839_s16), 7  ;;  %920 = vmatprep.subr.bf16.mxu0 %v919_v3  ;;  %v927_v11 = vpack.c.bf16 %v430_v8, %v428_v7  ;;  %v929_v12 = vpack.c.bf16 %v429_v10, %v427_v9  ;;  %v432_v13 = vld [vmem:[#allocation2 + $0x28] sm:$0xff]  ;;  %v434_v14 = vld [vmem:[#allocation2 + $0x38] sm:$0xff]  ;;  %v431_v15 = vld [vmem:[#allocation2 + $0x20] sm:$0xff]  ;;  %s1209_s28 = smov [#allocation7]  }
  0x54   : > { %s840_s18 = sshll.u32 %s1490_s16, 3  ;;  %922 = vmatpush3.bf16.msra.mxu0 %v919_v3  ;;  %v931_v16 = vpack.c.bf16 %v434_v14, %v432_v13  ;;  %v433_v17 = vld [vmem:[#allocation2 + $0x30] sm:$0xff]  ;;  %v436_v18 = vld [vmem:[#allocation2 + $0x48] sm:$0xff]  ;;  %v438_v19 = vld [vmem:[#allocation2 + $0x58] sm:$0xff]  ;;  %s1134_s19 = sshll.u32 %s1209_s28, 4  ;;  %s1135_s19 = int_to_ptr.vmem [resolvable:$false] %s1134_s19 }
  0x55   : > { %s1376_s21 = scalar_lea.vmem %s1461_s0, %s840_s18  ;;  %924 = vmatprep.subr.bf16.mxu0 %v923_v6  ;;  %928 = vmatprep.subr.bf16.mxu1 %v927_v11  ;;  %v933_v20 = vpack.c.bf16 %v433_v17, %v431_v15  ;;  %v935_v22 = vpack.c.bf16 %v438_v19, %v436_v18  ;;  %v435_v23 = vld [vmem:[#allocation2 + $0x40] sm:$0xff]  ;;  %v437_v24 = vld [vmem:[#allocation2 + $0x50] sm:$0xff]  ;;  %v440_v26 = vld [vmem:[#allocation2 + $0x68] sm:$0xff]  ;;  %s1136_s16 = scalar_lea.vmem %s1135_s19, 1024 }
  0x56   : > { %v310_v5 = vld [vmem:[%s1376_s21] sm:$0xff]  ;;  %930 = vmatpush1.bf16.msra.mxu1 %v929_v12  ;;  %v311_v21 = vld [vmem:[%s1376_s21 + $0x8] sm:$0xff]  ;;  %v312_v25 = vld [vmem:[%s1376_s21 + $0x10] sm:$0xff]  ;;  %v937_v28 = vpack.c.bf16 %v437_v24, %v435_v23 }
  0x57   : > { %913 = vmatprep.mubr.msk.f32.mxu0 %vm325_vm0, %v310_v5  ;;  %932 = vmatprep.subr.bf16.mxu1 %v931_v16  ;;  %v442_v27 = vld [vmem:[#allocation2 + $0x78] sm:$0xff]  ;;  %v439_v31 = vld [vmem:[#allocation2 + $0x60] sm:$0xff]  ;;  %v441_v32 = vld [vmem:[#allocation2 + $0x70] sm:$0xff] }
  0x58   : > { %926 = vmatpush3.bf16.msra.mxu0 %v923_v6  ;;  %v313_v29 = vld [vmem:[%s1376_s21 + $0x18] sm:$0xff]  ;;  %v939_v30 = vpack.c.bf16 %v442_v27, %v440_v26  ;;  %v444_v33 = vld [vmem:[#allocation2 + $0x88] sm:$0xff]  ;;  %v941_v35 = vpack.c.bf16 %v441_v32, %v439_v31  ;;  %v443_v37 = vld [vmem:[#allocation2 + $0x80] sm:$0xff]  ;;  %s300_s21 = sand.u32 1, %s1192_s25  }
  0x59   : > { %v446_v34 = vld [vmem:[#allocation2 + $0x98] sm:$0xff]  ;;  %v445_v38 = vld [vmem:[#allocation2 + $0x90] sm:$0xff]  ;;  %v448_v39 = vld [vmem:[#allocation2 + $0xa8] sm:$0xff]  ;;  %s838_s22 = sshll.u32 %s300_s21, 5  ;;  %s1420_s14 = scalar_lea.sflag [#allocation4], %s300_s21 }
  0x5a   : > { %934 = vmatpush1.bf16.msra.mxu1 %v933_v20  ;;  %v943_v36 = vpack.c.bf16 %v446_v34, %v444_v33  ;;  %v450_v40 = vld [vmem:[#allocation2 + $0xb8] sm:$0xff]  ;;  %v945_v41 = vpack.c.bf16 %v445_v38, %v443_v37  ;;  %v447_v43 = vld [vmem:[#allocation2 + $0xa0] sm:$0xff]  ;;  %v449_v44 = vld [vmem:[#allocation2 + $0xb0] sm:$0xff]  ;;  %s302_s23 = scalar_lea.vmem [#allocation7], %s838_s22 }
  0x5b   : > { %914 = vmatmul.mubr.msk.f32.vlgmr.msra.gmra.mrb[0].mxu0 %vm325_vm0, %v311_v21  ;;  %936 = vmatprep.subr.bf16.mxu1 %v935_v22  ;;  %v947_v42 = vpack.c.bf16 %v450_v40, %v448_v39  ;;  %v452_v45 = vld [vmem:[#allocation2 + $0xc8] sm:$0xff]  ;;  %v454_v46 = vld [vmem:[#allocation2 + $0xd8] sm:$0xff]  ;;  %v949_v47 = vpack.c.bf16 %v449_v44, %v447_v43  ;;  %v451_v49 = vld [vmem:[#allocation2 + $0xc0] sm:$0xff]  ;;  %s746_s8 = sshll.u32 %s302_s23, 4  ;;  %s1418_s8 = int_to_ptr.vmem [resolvable:$true] %s746_s8 }
  0x5c   : > { %916 = vmatprep.mubr.msk.f32.mxu0 %vm325_vm0, %v312_v25  ;;  %v951_v48 = vpack.c.bf16 %v454_v46, %v452_v45  ;;  %v453_v50 = vld [vmem:[#allocation2 + $0xd0] sm:$0xff]  ;;  %v456_v52 = vld [vmem:[#allocation2 + $0xe8] sm:$0xff]  ;;  %v458_v53 = vld [vmem:[#allocation2 + $0xf8] sm:$0xff]  ;;  %s1130_s17 = scalar_lea.vmem %s1418_s8, 512  ;;  %p1137_p4 = scmp.lt.s32.totalorder %s1418_s8, %s1135_s19 }
  0x5d   : > { %v953_v51 = vpack.c.bf16 %v453_v50, %v451_v49  ;;  %v955_v54 = vpack.c.bf16 %v458_v53, %v456_v52  ;;  %v455_v55 = vld [vmem:[#allocation2 + $0xe0] sm:$0xff]  ;;  %v457_v56 = vld [vmem:[#allocation2 + $0xf0] sm:$0xff]  ;;  %v585_v60 = vld [vmem:[#allocation5 + $0x88] sm:$0xff]  ;;  %p1131_p12 = scmp.ne.s32.totalorder %s1418_s8, %s1130_s17  ;;  %p1138_p7 = scmp.lt.s32.totalorder %s1136_s16, %s1130_s17 }
  0x5e   : > { %938 = vmatpush1.bf16.msra.mxu1 %v937_v28  ;;  %v957_v57 = vpack.c.bf16 %v457_v56, %v455_v55  ;;  %v584_v59 = vld [vmem:[#allocation5 + $0x80] sm:$0xff]  ;;  %v569_v63 = vld [vmem:[#allocation5 + $0x8] sm:$0xff]  ;;  %v586_v0 = vld [vmem:[#allocation5 + $0x90] sm:$0xff]  ;;  %v461_v56 = vlaneseq }
  0x5f   : > { %917 = vmatmul.mubr.msk.f32.gmra.mrb[2].mxu0 %vm325_vm0, %v313_v29  ;;  %940 = vmatprep.subr.bf16.mxu1 %v939_v30  ;;  %v568_v61 = vld [vmem:[#allocation5] sm:$0xff]  ;;  %v959_v62 = vpack.c.bf16 %v585_v60, %v584_v59  ;;  %v587_v1 = vld [vmem:[#allocation5 + $0x98] sm:$0xff]  ;;  %v570_v4 = vld [vmem:[#allocation5 + $0x10] sm:$0xff]  ;;  %p1132_p2 = pnand %p1131_p12, %p1482_p1  ;;  %p1139_p8 = por %p1138_p7, %p1137_p4 }
  0x60   : > { %v961_v2 = vpack.c.bf16 %v569_v63, %v568_v61  ;;  %v963_v3 = vpack.c.bf16 %v587_v1, %v586_v0  ;;  %v571_v5 = vld [vmem:[#allocation5 + $0x18] sm:$0xff]  ;;  %v588_v6 = vld [vmem:[#allocation5 + $0xa0] sm:$0xff]  ;;  %v589_v7 = vld [vmem:[#allocation5 + $0xa8] sm:$0xff] }
  0x61   : > { %960 = vmatprep.subr.bf16.mxu0 %v959_v62  ;;  %v965_v8 = vpack.c.bf16 %v571_v5, %v570_v4  ;;  %v967_v9 = vpack.c.bf16 %v589_v7, %v588_v6  ;;  %v572_v10 = vld [vmem:[#allocation5 + $0x20] sm:$0xff]  ;;  %v573_v11 = vld [vmem:[#allocation5 + $0x28] sm:$0xff]  ;;  %v590_v12 = vld [vmem:[#allocation5 + $0xb0] sm:$0xff]  ;;  %p1133_p3 = pneg %p1132_p2 }
  0x62   : > { %942 = vmatpush1.bf16.msra.mxu1 %v941_v35  ;;  %962 = vmatpush3.bf16.msra.mxu0 %v961_v2  ;;  %v591_v13 = vld [vmem:[#allocation5 + $0xb8] sm:$0xff]  ;;  %v969_v14 = vpack.c.bf16 %v573_v11, %v572_v10  ;;  %v574_v16 = vld [vmem:[#allocation5 + $0x30] sm:$0xff]  ;;  %v592_v18 = vld [vmem:[#allocation5 + $0xc0] sm:$0xff] }
  0x63   : > { %944 = vmatprep.subr.bf16.mxu1 %v943_v36  ;;  %964 = vmatprep.subr.bf16.mxu0 %v963_v3  ;;  %v971_v15 = vpack.c.bf16 %v591_v13, %v590_v12  ;;  %v575_v17 = vld [vmem:[#allocation5 + $0x38] sm:$0xff]  ;;  %v593_v19 = vld [vmem:[#allocation5 + $0xc8] sm:$0xff]  ;;  %v576_v22 = vld [vmem:[#allocation5 + $0x40] sm:$0xff]  ;;  %p1140_p11 = pnand %p1139_p8, %p1133_p3 }
  0x64   : > { %v973_v20 = vpack.c.bf16 %v575_v17, %v574_v16  ;;  %v975_v21 = vpack.c.bf16 %v593_v19, %v592_v18  ;;  %v577_v23 = vld [vmem:[#allocation5 + $0x48] sm:$0xff]  ;;  %v594_v24 = vld [vmem:[#allocation5 + $0xd0] sm:$0xff]  ;;  %v595_v25 = vld [vmem:[#allocation5 + $0xd8] sm:$0xff] }
  0x65   : > { %v977_v26 = vpack.c.bf16 %v577_v23, %v576_v22  ;;  %v979_v27 = vpack.c.bf16 %v595_v25, %v594_v24  ;;  %v578_v28 = vld [vmem:[#allocation5 + $0x50] sm:$0xff]  ;;  %v579_v29 = vld [vmem:[#allocation5 + $0x58] sm:$0xff]  ;;  %v596_v30 = vld [vmem:[#allocation5 + $0xe0] sm:$0xff] }
  0x66   : > { %946 = vmatpush1.bf16.msra.mxu1 %v945_v41  ;;  %966 = vmatpush3.bf16.msra.mxu0 %v965_v8  ;;  %v597_v31 = vld [vmem:[#allocation5 + $0xe8] sm:$0xff]  ;;  %v981_v32 = vpack.c.bf16 %v579_v29, %v578_v28  ;;  %v841_v34 = vld [vmem:[%s1463_s2] ss:$0 sm:$0xff]  ;;  %v598_v50 = vld [vmem:[#allocation5 + $0xf0] sm:$0xff] }
  0x67   : > { %948 = vmatprep.subr.bf16.mxu1 %v947_v42  ;;  %968 = vmatprep.subr.bf16.mxu0 %v967_v9  ;;  %v983_v33 = vpack.c.bf16 %v597_v31, %v596_v30  ;;  %v582_v53 = vld [vmem:[#allocation5 + $0x70] sm:$0xff]  ;;  %v846_v25 = vld [vmem:[%s1467_s6] ss:$0 sm:$0xff] }
  0x6a   : > { %950 = vmatpush1.bf16.msra.mxu1 %v949_v47  ;;  %970 = vmatpush3.bf16.msra.mxu0 %v969_v14  ;;  %v580_v47 = vld [vmem:[#allocation5 + $0x60] sm:$0xff] }
  0x6b   : > { %952 = vmatprep.subr.bf16.mxu1 %v951_v48  ;;  %972 = vmatprep.subr.bf16.mxu0 %v971_v15  ;;  %v581_v48 = vld [vmem:[#allocation5 + $0x68] sm:$0xff] }
  0x6c   : > { %v985_v49 = vpack.c.bf16 %v581_v48, %v580_v47 }
  0x6e   : > { %954 = vmatpush1.bf16.msra.mxu1 %v953_v51  ;;  %974 = vmatpush3.bf16.msra.mxu0 %v973_v20  ;;  %v599_v51 = vld [vmem:[#allocation5 + $0xf8] sm:$0xff] }
  0x6f   : > { %956 = vmatprep.subr.bf16.mxu1 %v955_v54  ;;  %976 = vmatprep.subr.bf16.mxu0 %v975_v21  ;;  %v987_v52 = vpack.c.bf16 %v599_v51, %v598_v50  ;;  %v583_v54 = vld [vmem:[#allocation5 + $0x78] sm:$0xff] }
  0x70   : > { %v989_v55 = vpack.c.bf16 %v583_v54, %v582_v53 }
  0x72   : > { %958 = vmatpush1.bf16.msra.mxu1 %v957_v57  ;;  %978 = vmatpush3.bf16.msra.mxu0 %v977_v26  ;;  %v462_v57 = vshrl.u32 %v461_v56, 7 }
  0x73   : > { %980 = vmatprep.subr.bf16.mxu0 %v979_v27 }
  0x74   : > { %v463_v59 = vsub.s32 0, %v462_v57  ;;  %v467_v60 = vsub.s32 1, %v462_v57 }
  0x76   : > { %982 = vmatpush3.bf16.msra.mxu0 %v981_v32 }
  0x77   : > { %984 = vmatprep.subr.bf16.mxu0 %v983_v33 }
  0x7a   : > { %986 = vmatpush3.bf16.msra.mxu0 %v985_v49 }
  0x7b   : > { %988 = vmatprep.subr.bf16.mxu0 %v987_v52 }
  0x7e   : > { %990 = vmatpush3.bf16.msra.mxu0 %v989_v55 }
 0x12e   : > { %v915_v35 = vpop.f32.mrb[0].mxu0 }
 0x12f   : > { %v404_v36 = vpop.f32.mrb[1].mxu0  ;;  %v410_v38 = vadd.f32 %v915_v35, %v841_v34 }
 0x130   : > { %v405_v37 = vadd.f32 %v841_v34, %v404_v36 }
 0x131   : > { %v424_v43 = vmax.f32 %v410_v38, 0.0 }
 0x132   : > { %v423_v39 = vmax.f32 %v405_v37, 0.0  ;;  %v918_v40 = vpop.f32.mrb[2].mxu0 }
 0x133   : > { %v414_v41 = vpop.f32.mrb[3].mxu0  ;;  %v420_v45 = vadd.f32 %v918_v40, %v841_v34 }
 0x134   : > { %536 = vmatmul.mubr.f32.vlgmr.msra.gmra.mrb[0].mxu1 %v423_v39  ;;  %v415_v42 = vadd.f32 %v841_v34, %v414_v41 }
 0x135   : > { %541 = vmatprep.mubr.f32.mxu1 %v1208_v58  ;;  %v426_v46 = vmax.f32 %v420_v45, 0.0 }
 0x136   : > { %v425_v44 = vmax.f32 %v415_v42, 0.0 }
 0x138   : > { %542 = vmatmul.mubr.f32.gmra.mrb[2].mxu1 %v424_v43 }
 0x139   : > { %547 = vmatprep.mubr.f32.mxu1 %v1208_v58 }
 0x13c   : > { %548 = vmatmul.mubr.f32.gmra.mrb[4].mxu1 %v425_v44 }
 0x13d   : > { %553 = vmatprep.mubr.f32.mxu1 %v1208_v58  ;;  %v459_v58 = vld [vmem:[%s1465_s4] sm:$0x3] }
 0x13e   : > { %v464_v61 = vrot.slane %v459_v58, %v463_v59  ;;  %v468_v62 = vrot.slane %v459_v58, %v467_v60 }
 0x140   : > { %554 = vmatmul.mubr.f32.gmra.mrb[6].mxu1 %v426_v46 }
 0x207   : > { %v537_v63 = vpop.f32.mrb[0].mxu1 }
 0x208   : > { %v538_v0 = vadd.f32 %v537_v63, %v464_v61  ;;  %v539_v1 = vpop.f32.mrb[1].mxu1 }
 0x209   : > { %v540_v2 = vadd.f32 %v539_v1, %v468_v62 }
 0x20a   : > { %v560_v5 = vmax.f32 %v538_v0, 0.0 }
 0x20b   : > { %v561_v3 = vmax.f32 %v540_v2, 0.0  ;;  %v543_v4 = vpop.f32.mrb[2].mxu1 }
 0x20c   : > { %v544_v6 = vadd.f32 %v543_v4, %v464_v61  ;;  %v545_v7 = vpop.f32.mrb[3].mxu1 }
 0x20d   : > { %v546_v8 = vadd.f32 %v545_v7, %v468_v62  ;;  %671 = vmatprep.mubr.f32.mxu0 %v561_v3 }
 0x20e   : > { %672 = vmatmul.mubr.f32.vlgmr.msra.gmra.mrb[4].mxu0 %v560_v5  ;;  %v562_v11 = vmax.f32 %v544_v6, 0.0 }
 0x20f   : > { %v563_v9 = vmax.f32 %v546_v8, 0.0  ;;  %v549_v10 = vpop.f32.mrb[4].mxu1 }
 0x210   : > { %v550_v12 = vadd.f32 %v549_v10, %v464_v61  ;;  %v551_v13 = vpop.f32.mrb[5].mxu1 }
 0x211   : > { %v552_v14 = vadd.f32 %v551_v13, %v468_v62  ;;  %676 = vmatprep.mubr.f32.mxu0 %v563_v9 }
 0x212   : > { %677 = vmatmul.mubr.f32.gmra.mrb[6].mxu0 %v562_v11  ;;  %v564_v17 = vmax.f32 %v550_v12, 0.0 }
 0x213   : > { %v565_v15 = vmax.f32 %v552_v14, 0.0  ;;  %v555_v16 = vpop.f32.mrb[6].mxu1 }
 0x214   : > { %v556_v18 = vadd.f32 %v555_v16, %v464_v61  ;;  %v557_v19 = vpop.f32.mrb[7].mxu1 }
 0x215   : > { %v558_v20 = vadd.f32 %v557_v19, %v468_v62  ;;  %681 = vmatprep.mubr.f32.mxu0 %v565_v15 }
 0x216   : > { %682 = vmatmul.mubr.f32.gmra.mrb[8].mxu0 %v564_v17  ;;  %v566_v22 = vmax.f32 %v556_v18, 0.0 }
 0x217   : > { %v567_v21 = vmax.f32 %v558_v20, 0.0 }
 0x219   : > { %686 = vmatprep.mubr.f32.mxu0 %v567_v21 }
 0x21a   : > { %687 = vmatmul.mubr.f32.gmra.mrb[10].mxu0 %v566_v22 }
 0x2e1   : > { %v893_v23 = vpop.f32.mrb[4].mxu0 }
 0x2e2   : > { %v894_v24 = vpop.f32.mrb[5].mxu0 }
 0x2e3   : > { %v895_v26 = vadd.f32 %v894_v24, %v893_v23 }
 0x2e5   : > { %v896_v27 = vpop.f32.mrb[6].mxu0  ;;  %v674_v28 = vadd.f32 %v895_v26, %v846_v25 }
 0x2e6   : > { %v897_v29 = vpop.f32.mrb[7].mxu0 }
 0x2e7   : > { %v898_v30 = vadd.f32 %v897_v29, %v896_v27  ;;  %692 = vmax.xlane.f32.xlu0 %v674_v28 }
 0x2e9   : > { %v899_v31 = vpop.f32.mrb[8].mxu0  ;;  %v679_v32 = vadd.f32 %v898_v30, %v846_v25 }
 0x2ea   : > { %v900_v33 = vpop.f32.mrb[9].mxu0 }
 0x2eb   : > { %v901_v34 = vadd.f32 %v900_v33, %v899_v31  ;;  %694 = vmax.xlane.f32.xlu0 %v679_v32 }
 0x2ed   : > { %v902_v35 = vpop.f32.mrb[10].mxu0  ;;  %v684_v36 = vadd.f32 %v901_v34, %v846_v25 }
 0x2ee   : > { %v903_v37 = vpop.f32.mrb[11].mxu0 }
 0x2ef   : > { %v904_v38 = vadd.f32 %v903_v37, %v902_v35  ;;  %696 = vmax.xlane.f32.xlu1 %v684_v36 }
 0x2f1   : > { %v689_v39 = vadd.f32 %v904_v38, %v846_v25 }
 0x2f3   : > { %698 = vmax.xlane.f32.xlu1 %v689_v39 }
 0x374   : > { %v693_v40 = vpop.xlane.xlu0 %692 }
 0x375   : > { %v700_v41 = vsub.f32 %v674_v28, %v693_v40 }
 0x377   : > { %v704_v42 = vmul.f32 1.442695, %v700_v41 }
 0x378   : > { %v695_v43 = vpop.xlane.xlu0 %694 }
 0x379   : > { %1058 = vpow2.f32 %v704_v42  ;;  %v701_v44 = vsub.f32 %v679_v32, %v695_v43 }
 0x37b   : > { %v706_v45 = vmul.f32 1.442695, %v701_v44 }
 0x37c   : > { %v697_v46 = vpop.xlane.xlu1 %696 }
 0x37d   : > { %1060 = vpow2.f32 %v706_v45  ;;  %v702_v47 = vsub.f32 %v684_v36, %v697_v46 }
 0x37f   : > { %v708_v48 = vmul.f32 1.442695, %v702_v47 }
 0x380   : > { %v699_v49 = vpop.xlane.xlu1 %698 }
 0x381   : > { %1062 = vpow2.f32 %v708_v48  ;;  %v703_v50 = vsub.f32 %v689_v39, %v699_v49 }
 0x383   : > { %v1059_v51 = vpop.eup %1058  ;;  %v710_v52 = vmul.f32 1.442695, %v703_v50 }
 0x384   : > { %712 = vadd.xlane.f32.xlu0 %v1059_v51 }
 0x385   : > { %1064 = vpow2.f32 %v710_v52 }
 0x387   : > { %v1061_v53 = vpop.eup %1060 }
 0x388   : > { %714 = vadd.xlane.f32.xlu1 %v1061_v53 }
 0x38b   : > { %v1063_v54 = vpop.eup %1062 }
 0x38c   : > { %716 = vadd.xlane.f32.xlu0 %v1063_v54 }
 0x38f   : > { %v1065_v55 = vpop.eup %1064 }
 0x390   : > { %718 = vadd.xlane.f32.xlu1 %v1065_v55 }
 0x411   : > { %v713_v56 = vpop.xlane.xlu0 %712 }
 0x412   : > { %1066 = vrcp.f32 %v713_v56 }
 0x415   : > { %v715_v57 = vpop.xlane.xlu1 %714 }
 0x416   : > { %1068 = vrcp.f32 %v715_v57 }
 0x419   : > { %v717_v59 = vpop.xlane.xlu0 %716 }
 0x41a   : > { %1070 = vrcp.f32 %v717_v59 }
 0x41c   : > { %v1067_v58 = vpop.eup %1066 }
 0x41d   : > { %v721_v60 = vmul.f32 %v1067_v58, %v1059_v51  ;;  %v719_v61 = vpop.xlane.xlu1 %718 }
 0x41e   : > { %1072 = vrcp.f32 %v719_v61 }
 0x41f   : > { %728 = vst [vmem:[%s302_s23] sm:$0xff] %v721_v60 }
 0x420   : > { %v1069_v62 = vpop.eup %1068 }
 0x421   : > { %v723_v63 = vmul.f32 %v1069_v62, %v1061_v53 }
 0x423   : > { %729 = vst [vmem:[%s302_s23 + $0x8] sm:$0xff] %v723_v63 }
 0x424   : > { %v1071_v0 = vpop.eup %1070 }
 0x425   : > { %v725_v1 = vmul.f32 %v1071_v0, %v1063_v54 }
 0x427   : > { %730 = vst [vmem:[%s302_s23 + $0x10] sm:$0xff] %v725_v1 }
 0x428   : > { %v1073_v2 = vpop.eup %1072 }
 0x429   : > { %v727_v3 = vmul.f32 %v1073_v2, %v1065_v55 }
 0x42b   : > { %731 = vst [vmem:[%s302_s23 + $0x18] sm:$0xff] %v727_v3 }
 0x42c   : > { %1143 = shalt.err (!%p1140_p11)
}
 0x42d   : > { %s1144_s18 = scalar_lea.hbm %s1416_s10, 512  ;;  %s1148_s21 = scalar_lea.hbm %s1468_s7, 1024 }
 0x42e   : > { %p1145_p13 = scmp.ne.s32.totalorder %s1416_s10, %s1144_s18  ;;  %p1149_p6 = scmp.lt.u32.totalorder %s1416_s10, %s1468_s7 }
 0x42f   : > { %p1150_p9 = scmp.lt.u32.totalorder %s1148_s21, %s1144_s18  ;;  %p1152_p12 = scmp.lt.u32.totalorder %s1144_s18, %s1416_s10 }
 0x430   : > { %p1146_p0 = pnand %p1145_p13, %p1482_p1 }
 0x431   : > { %p1151_p10 = por %p1150_p9, %p1149_p6 }
 0x432   : > { %p1147_p5 = pneg %p1146_p0 }
 0x433   : > { %p1153_p2 = por %p1152_p12, %p1151_p10 }
 0x435   : > { %p1154_p3 = pnand %p1153_p2, %p1147_p5 }
 0x437   : > { %1157 = shalt.err (!%p1154_p3)
}
 0x438   : > { %s1210_s29 = smov 128   ;;  %s1211_s9 = smov 8  }
 0x439   : > { %999 = dma.vmem_to_hbm [thread:$0]  (%p1482_p1), %s1418_s8, 512, %s1416_s10, %s1420_s14, %s1210_s29, %s1210_s29, %s1211_s9  }
 0x43a PF: > { %p1016_p4 = scmp.ge.s32.totalorder %s1200_s27, 2  ;;  %s761_s15 = sand.u32 1, %s1188_s24  }
 0x43b   : > { %p1483_p7 = scmp.ne.s32.totalorder %s1474_s12, 0  ;;  %s762_s17 = scalar_lea.sflag [#allocation4], %s761_s15 }
 0x43d   : > { %p1009_p8 = pnand %p1016_p4, %p1483_p7 }
 0x43f   : > { %1183 = dma.done.wait (!%p1009_p8), %s762_s17, 512  }
 0x440   : > { %1185 = vsyncadd (!%p1009_p8), %s762_s17, 4294966784  ;;  %s1484_s28 = sld [smem:[#allocation11_spill]]  ;;  %p19_p11 = scmp.ge.s32.totalorder %s1277_s30, 4  }
 0x441   : > { %s1485_s24 = smov %s1192_s25  ;;  %s1486_s25 = smov %s1196_s26 }
 0x442   : > { %s1488_s27 = smov %s1277_s30  ;;  %21 = sbr.rel (!%p19_p11) target bundleno = 5 (0x5), region = 92 }
 0x446   : > { %s1487_s26 = smov %s1484_s28 }
 0x449   :  { %767 = vsyncpa [#allocation3], 1 }
 0x44a   :  { %769 = vsyncpa [#allocation3 + $0x1], 1 }
 0x44b   :  { %770 = vsyncpa [#allocation6], 1 }
 0x44c   :  { %771 = vsyncpa [#allocation4], 1 }
 0x44d   :  { %773 = vsyncpa [#allocation4 + $0x1], 1 }

</bundles_post_ra>
